<compile_context>
chip_gen: v7x
topology: tpu7x:2x2x1
jax: 0.10.0
libtpu: 0.0.40
codegen_flags: <defaults>
</compile_context>

<pallas_src>
import functools

import jax
import jax.numpy as jnp
from jax.experimental import pallas as pl
from jax.experimental.pallas import tpu as pltpu

_SUBLANE = 8
_LANE = 128
# Per-block element budget (~2 MiB for f32 once lane padding is counted).
# Keeps input double-buffers + in-kernel f32 intermediates comfortably under
# the smallest default scoped-VMEM limit (16 MiB v5e, 32 MiB v6e/v7x).
_DEFAULT_BLOCK_ELEMS = 512 * 1024


def _round_up(a: int, b: int) -> int:
    return (a + b - 1) // b * b


def _choose_tiles(nc: int, hw: int, max_block_elems: int):
    """Pick (row_tile, hw_tile) so one input block fits the VMEM budget."""
    # Reduction (H*W) axis: keep it un-tiled unless a reasonably tall row block
    # (up to 512 rows) times the lane-padded spatial extent would blow the
    # budget; otherwise tile it in multiples of 128 lanes.
    min_rows = min(_round_up(nc, _SUBLANE), 512)
    if min_rows * _round_up(hw, _LANE) <= max_block_elems:
        hw_tile = hw
    else:
        hw_tile = max(_LANE, (max_block_elems // min_rows) // _LANE * _LANE)

    # Row (N*C) axis: as many rows as the budget allows (amortizes the
    # ~0.35 us/step overhead); multiple of 8 (sublane granularity).
    lanes = _round_up(hw_tile, _LANE)            # VMEM footprint is lane-padded
    row_cap = max(_SUBLANE, (max_block_elems // lanes) // _SUBLANE * _SUBLANE)
    row_tile = min(row_cap, _round_up(nc, _SUBLANE))

    # Prefer >=2 row blocks so the "parallel" axis can use both v7x cores.
    if pl.cdiv(nc, row_tile) < 2 and row_tile > _SUBLANE:
        row_tile = _round_up(pl.cdiv(nc, 2), _SUBLANE)

    return row_tile, hw_tile


def _concat_pool_kernel(x_ref, out_ref, max_acc, sum_acc, *,
                        hw, hw_tile, needs_mask, inv_hw):
    """Grid = (row blocks [parallel], H*W blocks [arbitrary, reduction])."""
    k = pl.program_id(1)

    @pl.when(k == 0)
    def _init():
        max_acc[...] = jnp.full(max_acc.shape, -jnp.inf, max_acc.dtype)
        sum_acc[...] = jnp.zeros(sum_acc.shape, sum_acc.dtype)

    x = x_ref[...].astype(jnp.float32)           # (row_tile, hw_tile)
    if needs_mask:
        # Neutralize out-of-bounds H*W columns of the ragged last block.
        col = k * hw_tile + jax.lax.broadcasted_iota(jnp.int32, x.shape, 1)
        valid = col < hw
        x_max = jnp.where(valid, x, -jnp.inf)
        x_sum = jnp.where(valid, x, 0.0)
    else:
        x_max = x
        x_sum = x

    max_acc[...] = jnp.maximum(max_acc[...],
                               jnp.max(x_max, axis=-1, keepdims=True))
    sum_acc[...] = sum_acc[...] + jnp.sum(x_sum, axis=-1, keepdims=True)

    @pl.when(k == pl.num_programs(1) - 1)
    def _finalize():
        # Fused output block (row_tile, 2): column 0 = max, column 1 = mean.
        is_max_col = jax.lax.broadcasted_iota(jnp.int32, out_ref.shape, 1) == 0
        out_ref[...] = jnp.where(is_max_col, max_acc[...],
                                 sum_acc[...] * inv_hw).astype(out_ref.dtype)


def adaptive_concat_pool2d(x, *, max_block_elems=_DEFAULT_BLOCK_ELEMS):
    """x: (N, C, H, W). Returns (N, 2*C, 1, 1) = concat([max, mean], axis=1)."""
    N, C, H, W = x.shape
    NC, HW = N * C, H * W
    x2d = x.reshape(NC, HW)                      # free: contiguous view

    row_tile, hw_tile = _choose_tiles(NC, HW, max_block_elems)
    grid = (pl.cdiv(NC, row_tile), pl.cdiv(HW, hw_tile))
    needs_mask = (HW % hw_tile) != 0

    itemsize = x.dtype.itemsize
    cost = pl.CostEstimate(
        flops=2 * NC * HW,                       # one cmp + one add per element
        transcendentals=0,
        bytes_accessed=NC * HW * itemsize + 2 * NC * itemsize,
    )

    kernel = functools.partial(
        _concat_pool_kernel,
        hw=HW, hw_tile=hw_tile, needs_mask=needs_mask, inv_hw=1.0 / HW)

    pooled = pl.pallas_call(
        kernel,
        out_shape=jax.ShapeDtypeStruct((NC, 2), x.dtype),
        grid_spec=pltpu.PrefetchScalarGridSpec(
            num_scalar_prefetch=0,
            grid=grid,
            in_specs=[pl.BlockSpec((row_tile, hw_tile), lambda i, k: (i, k))],
            out_specs=pl.BlockSpec((row_tile, 2), lambda i, k: (i, 0)),
            scratch_shapes=[pltpu.VMEM((row_tile, 1), jnp.float32),
                            pltpu.VMEM((row_tile, 1), jnp.float32)],
        ),
        compiler_params=pltpu.CompilerParams(
            dimension_semantics=("parallel", "arbitrary")),
        cost_estimate=cost,
    )(x2d)

    max_pooled = pooled[:, 0].reshape(N, C, 1, 1)
    avg_pooled = pooled[:, 1].reshape(N, C, 1, 1)
    # torch.cat([mp(x), ap(x)], 1): max first, then avg.
    return jnp.concatenate([max_pooled, avg_pooled], axis=1)


def _reference(x):
    return jnp.concatenate(
        [jnp.max(x, axis=(2, 3), keepdims=True),
         jnp.mean(x, axis=(2, 3), keepdims=True)], axis=1)


if __name__ == "__main__":
    key = jax.random.PRNGKey(0)
    k0, k1 = jax.random.split(key)

    # Main check: small shape consistent with the module's forward.
    N, C, H, W = 2, 4, 16, 16
    x = jax.random.normal(k0, (N, C, H, W), dtype=jnp.float32)
    out = jax.block_until_ready(adaptive_concat_pool2d(x))
    assert out.shape == (N, 2 * C, 1, 1), out.shape
    assert jnp.allclose(out, _reference(x), atol=1e-5, rtol=1e-5), "mismatch"

    # Second check: force a tiny block budget so the tiled + masked reduction
    # path (multiple "arbitrary" H*W blocks, ragged edge) is also exercised.
    x2 = jax.random.normal(k1, (2, 4, 13, 13), dtype=jnp.float32)
    out2 = jax.block_until_ready(
        adaptive_concat_pool2d(x2, max_block_elems=1024))
    assert out2.shape == (2, 8, 1, 1), out2.shape
    assert jnp.allclose(out2, _reference(x2), atol=1e-5, rtol=1e-5), "mismatch"

    print("KERNEL_OK")
</pallas_src>

<mosaic_0001>
module attributes {stable_mosaic.version = 11 : i64} {
  func.func @_concat_pool_kernel(%arg0: i32, %arg1: i32, %arg2: memref<8x256xf32, #tpu.memory_space<vmem>>, %arg3: memref<8x2xf32, #tpu.memory_space<vmem>>, %arg4: memref<8x1xf32, #tpu.memory_space<vmem>>, %arg5: memref<8x1xf32, #tpu.memory_space<vmem>>) attributes {dimension_semantics = [#tpu.dimension_semantics<parallel>, #tpu.dimension_semantics<arbitrary>], iteration_bounds = array<i64: 1, 1>, scalar_prefetch = 0 : i64, scratch_operands = 2 : i64, tpu.core_type = #tpu.core_type<tc>, window_params = [{transform_indices = @transform_0, window_bounds = array<i64: 8, 256>}, {transform_indices = @transform_1, window_bounds = array<i64: 8, 2>}]} {
    %c0_i32 = arith.constant 0 : i32
    %0 = arith.cmpi eq, %arg1, %c0_i32 : i32
    %1 = arith.extui %0 : i1 to i32
    %c0_i32_0 = arith.constant 0 : i32
    %2 = arith.cmpi ne, %1, %c0_i32_0 : i32
    scf.if %2 {
      %cst_13 = arith.constant 0xFF800000 : f32
      %17 = vector.broadcast %cst_13 : f32 to vector<8x1xf32>
      %c0_14 = arith.constant 0 : index
      %c0_15 = arith.constant 0 : index
      %18 = vector.load %arg4[%c0_14, %c0_15] : memref<8x1xf32, #tpu.memory_space<vmem>>, vector<8x1xf32>
      tpu.vector_store %arg4[%c0_14, %c0_15], %17 {strides = array<i32>} : memref<8x1xf32, #tpu.memory_space<vmem>>, vector<8x1xf32>,
      %cst_16 = arith.constant 0.000000e+00 : f32
      %19 = vector.broadcast %cst_16 : f32 to vector<8x1xf32>
      %c0_17 = arith.constant 0 : index
      %c0_18 = arith.constant 0 : index
      %20 = vector.load %arg5[%c0_17, %c0_18] : memref<8x1xf32, #tpu.memory_space<vmem>>, vector<8x1xf32>
      tpu.vector_store %arg5[%c0_17, %c0_18], %19 {strides = array<i32>} : memref<8x1xf32, #tpu.memory_space<vmem>>, vector<8x1xf32>,
    } else {
    }
    %c0 = arith.constant 0 : index
    %c0_1 = arith.constant 0 : index
    %3 = vector.load %arg2[%c0, %c0_1] : memref<8x256xf32, #tpu.memory_space<vmem>>, vector<8x256xf32>
    %c0_2 = arith.constant 0 : index
    %c0_3 = arith.constant 0 : index
    %4 = vector.load %arg4[%c0_2, %c0_3] : memref<8x1xf32, #tpu.memory_space<vmem>>, vector<8x1xf32>
    %cst = arith.constant dense<0xFF800000> : vector<8xf32>
    %5 = vector.multi_reduction <maximumf>, %3, %cst [1] : vector<8x256xf32> to vector<8xf32>
    %6 = vector.shape_cast %5 : vector<8xf32> to vector<8x1xf32>
    %7 = arith.maximumf %4, %6 : vector<8x1xf32>
    %c0_4 = arith.constant 0 : index
    %c0_5 = arith.constant 0 : index
    %8 = vector.load %arg4[%c0_4, %c0_5] : memref<8x1xf32, #tpu.memory_space<vmem>>, vector<8x1xf32>
    tpu.vector_store %arg4[%c0_4, %c0_5], %7 {strides = array<i32>} : memref<8x1xf32, #tpu.memory_space<vmem>>, vector<8x1xf32>,
    %c0_6 = arith.constant 0 : index
    %c0_7 = arith.constant 0 : index
    %9 = vector.load %arg5[%c0_6, %c0_7] : memref<8x1xf32, #tpu.memory_space<vmem>>, vector<8x1xf32>
    %cst_8 = arith.constant dense<0.000000e+00> : vector<8xf32>
    %10 = vector.multi_reduction <add>, %3, %cst_8 [1] : vector<8x256xf32> to vector<8xf32>
    %11 = vector.shape_cast %10 : vector<8xf32> to vector<8x1xf32>
    %12 = arith.addf %9, %11 : vector<8x1xf32>
    %c0_9 = arith.constant 0 : index
    %c0_10 = arith.constant 0 : index
    %13 = vector.load %arg5[%c0_9, %c0_10] : memref<8x1xf32, #tpu.memory_space<vmem>>, vector<8x1xf32>
    tpu.vector_store %arg5[%c0_9, %c0_10], %12 {strides = array<i32>} : memref<8x1xf32, #tpu.memory_space<vmem>>, vector<8x1xf32>,
    %c0_i32_11 = arith.constant 0 : i32
    %14 = arith.cmpi eq, %arg1, %c0_i32_11 : i32
    %15 = arith.extui %14 : i1 to i32
    %c0_i32_12 = arith.constant 0 : i32
    %16 = arith.cmpi ne, %15, %c0_i32_12 : i32
    scf.if %16 {
      %17 = tpu.iota {dimensions = array<i32: 1>} : vector<8x2xi32>
      %c0_i32_13 = arith.constant 0 : i32
      %18 = vector.broadcast %c0_i32_13 : i32 to vector<8x2xi32>
      %19 = arith.cmpi eq, %17, %18 : vector<8x2xi32>
      %c0_14 = arith.constant 0 : index
      %c0_15 = arith.constant 0 : index
      %20 = vector.load %arg4[%c0_14, %c0_15] : memref<8x1xf32, #tpu.memory_space<vmem>>, vector<8x1xf32>
      %c0_16 = arith.constant 0 : index
      %c0_17 = arith.constant 0 : index
      %21 = vector.load %arg5[%c0_16, %c0_17] : memref<8x1xf32, #tpu.memory_space<vmem>>, vector<8x1xf32>
      %cst_18 = arith.constant 3.906250e-03 : f32
      %22 = vector.broadcast %cst_18 : f32 to vector<8x1xf32>
      %23 = arith.mulf %21, %22 : vector<8x1xf32>
      %24 = vector.shape_cast %20 : vector<8x1xf32> to vector<8x1xf32>
      %25 = vector.broadcast %24 : vector<8x1xf32> to vector<8x2xf32>
      %26 = vector.shape_cast %23 : vector<8x1xf32> to vector<8x1xf32>
      %27 = vector.broadcast %26 : vector<8x1xf32> to vector<8x2xf32>
      %28 = arith.select %19, %25, %27 : vector<8x2xi1>, vector<8x2xf32>
      %c0_19 = arith.constant 0 : index
      %c0_20 = arith.constant 0 : index
      %29 = vector.load %arg3[%c0_19, %c0_20] : memref<8x2xf32, #tpu.memory_space<vmem>>, vector<8x2xf32>
      tpu.vector_store %arg3[%c0_19, %c0_20], %28 {strides = array<i32>} : memref<8x2xf32, #tpu.memory_space<vmem>>, vector<8x2xf32>,
    } else {
    }
    return
  }
  func.func @transform_0(%arg0: i32, %arg1: i32) -> (i32, i32) {
    %c0_i32 = arith.constant 0 : i32
    return %arg0, %arg1 : i32, i32
  }
  func.func @transform_1(%arg0: i32, %arg1: i32) -> (i32, i32) {
    %c0_i32 = arith.constant 0 : i32
    %c0_i32_0 = arith.constant 0 : i32
    return %arg0, %c0_i32 : i32, i32
  }
}

</mosaic_0001>

<bundles_post_ra>
// kernel: tpu_custom_call.1
= control target key start
LH: loop header
LB: loop body
LE: loop exit
PB: predicated region body
PF: predicated region fallthrough
CT: control target
= control target key end

     0   :  { %6 = vsyncpa [#allocation5], 0  ;;  %s99_s6 = smov [#allocation4]   ;;  %s132_s0 = inlined_call_operand.hbm [shape: f32[8,256], index: 0, kind: input, shape index: {}]   ;;  %s133_s1 = inlined_call_operand.vmem [shape: f32[8,2], index: 1, kind: output, shape index: {}]  }
   0x1   :  { %s13_s7 = sshll.u32 %s99_s6, 4  ;;  %s75_s10 = scalar_lea.hbm %s132_s0, 256  ;;  %s14_s7 = int_to_ptr.vmem [resolvable:$true] %s13_s7 }
   0x2   :  { %p76_p0 = scmp.ne.s32.totalorder %s132_s0, %s75_s10  ;;  %p79_p1 = scmp.lt.u32.totalorder %s75_s10, %s132_s0 }
   0x4   :  { %p81_p2 = pnand %p79_p1, %p76_p0 }
   0x6   :  { %84 = shalt.err (!%p81_p2)
}
   0x7   :  { %s85_s15 = scalar_lea.vmem %s14_s7, 256  ;;  %p90_p4 = scmp.lt.s32.totalorder %s14_s7, %s14_s7 }
   0x8   :  { %p86_p3 = scmp.ne.s32.totalorder %s14_s7, %s85_s15  ;;  %p91_p5 = scmp.lt.s32.totalorder %s85_s15, %s85_s15 }
   0xa   :  { %p92_p6 = por %p91_p5, %p90_p4 }
   0xc   :  { %p93_p7 = pnand %p92_p6, %p86_p3 }
   0xe   :  { %96 = shalt.err (!%p93_p7)
}
   0xf   :  { %16 = dma.hbm_to_vmem [thread:$0]  %s132_s0, 256, %s14_s7, [#allocation5]  }
  0x10   :  { %97 = dma.done.wait [#allocation5], 256  }
  0x11   :  { %98 = vsyncadd [#allocation5], 4294967040  ;;  %vm24_vm0 = vcmask 7168   ;;  %v100_v0 = vmov 0.0   ;;  %v27_v1 = vld [vmem:[#allocation4] sm:$0xff]  ;;  %v28_v2 = vld [vmem:[#allocation4 + $0x8] sm:$0xff]  ;;  %v45_v16 = vlaneseq }
  0x12   :  { %26 = vst.msk [vmem:[#allocation3] sm:$0xff] %vm24_vm0, %v100_v0  ;;  %v37_v3 = vadd.f32 %v28_v2, %v27_v1  ;;  %v30_v4 = vmax.f32 %v27_v1, %v28_v2  ;;  %v101_v5 = vmov -inf   ;;  %v102_v6 = vmov 0  }
  0x13   :  { %25 = vst.msk [vmem:[#allocation2] sm:$0xff] %vm24_vm0, %v101_v5  ;;  %73 = vset.pattern.permute.xlu1 %v102_v6  ;;  %74 = vset.pattern.permute.xlu0 %v102_v6  ;;  %v46_v17 = vand.u32 127, %v45_v16  ;;  %vm62_vm2 = vcmask 15360  }
  0x14   :  { %38 = vadd.xlane.f32.xlu0 %v37_v3 }
  0x15   :  { %vm47_vm1 = vcmp.eq.s32.totalorder %v46_v17, 0 }
  0x18   :  { %31 = vmax.xlane.f32.xlu0 %v30_v4 }
  0x19   :  { %v36_v7 = vld [vmem:[#allocation3] sm:$0xff] }
  0x1a   :  { %v29_v10 = vld [vmem:[#allocation2] sm:$0xff] }
  0xa1   :  { %v39_v8 = vpop.xlane.xlu0 %38 }
  0xa2   :  { %v40_v9 = vadd.f32 %v39_v8, %v36_v7 }
  0xa4   :  { %41 = vst.msk [vmem:[#allocation3] sm:$0xff] %vm24_vm0, %v40_v9 }
  0xa5   :  { %v32_v11 = vpop.xlane.xlu0 %31 }
  0xa6   :  { %v33_v12 = vmax.f32 %v29_v10, %v32_v11 }
  0xa8   :  { %35 = vst.msk [vmem:[#allocation2] sm:$0xff] %vm24_vm0, %v33_v12 }
  0xab   :  { %v49_v14 = vld [vmem:[#allocation3] sm:$0xff] }
  0xac   :  { %v50_v15 = vmul.f32 0.00390625, %v49_v14 }
  0xaf   :  { %v48_v13 = vld [vmem:[#allocation2] sm:$0xff] }
  0xb0   :  { %53 = vperm.xlu1 %73, %v48_v13  }
  0xb4   :  { %58 = vperm.xlu1 %73, %v50_v15  }
 0x12f   :  { %v54_v18 = vpop.permute.xlu1 %53 }
 0x133   :  { %v59_v19 = vpop.permute.xlu1 %58 }
 0x134   :  { %v61_v20 = vsel %vm47_vm1, %v54_v18, %v59_v19 }
 0x135   :  { %63 = vst.msk [vmem:[%s133_s1] sm:$0xff] %vm62_vm2, %v61_v20 }
 0x136   :  { %68 = vsyncpa [#allocation5], 1 }

</bundles_post_ra>
